<compile_context>
chip_gen: v6e
topology: v6e:2x2x1
jax: 0.10.0
libtpu: 0.0.40
codegen_flags: <defaults>
</compile_context>

<pallas_src>
import jax
import jax.numpy as jnp
import numpy as np
from jax.experimental import pallas as pl
from jax.experimental.pallas import tpu as pltpu


def _round_up(x, m):
    return (x + m - 1) // m * m


def _cnn_kernel(x_ref, w1_ref, w2_ref, wf_ref, b_ref, out_ref):
    x = x_ref[...]                                   # (B, L*C_in)
    b1 = b_ref[0:1, :]                               # (1, 256)
    b2 = b_ref[1:2, :]                               # (1, 256)
    bf = b_ref[2:3, 0:1]                             # (1, 1)

    # conv1 (k=3, pad=1) + ReLU as one dense matmul.
    # Output lanes ordered [pos0 | pos2 | pos1 | pos3] x 64 channels, so the
    # pool pairs (pos0,pos1) and (pos2,pos3) land in opposite 128-lane halves.
    h1 = jnp.maximum(
        jnp.dot(x, w1_ref[...], preferred_element_type=jnp.float32) + b1, 0.0)

    # max_pool1d(kernel=2, stride=2): vreg-aligned halves -> (B, 128) = [q0 | q1]
    p1 = jnp.maximum(h1[:, :128], h1[:, 128:])

    # conv2 (k=3, pad=1 on the pooled length-2 sequence) + ReLU as one matmul.
    # Output lanes: r0 channels at [0:32], r1 channels at [128:160], rest zero.
    h2 = jnp.maximum(
        jnp.dot(p1, w2_ref[...], preferred_element_type=jnp.float32) + b2, 0.0)

    # max_pool1d(kernel=2, stride=2): lanes 0..31 of p2 == flattened features.
    p2 = jnp.maximum(h2[:, :128], h2[:, 128:])       # (B, 128)

    # fc: weight rows 32..127 are zero, so the padded lanes contribute nothing.
    out_ref[...] = jnp.dot(p2, wf_ref[...], preferred_element_type=jnp.float32) + bf


def _build_dense_weights(params, C_in, L):
    """Fold the two small convolutions into dense matmul weights."""
    w1 = jnp.asarray(params["w1"], jnp.float32)      # (64, C_in, 3)
    b1 = jnp.asarray(params["b1"], jnp.float32)      # (64,)
    w2 = jnp.asarray(params["w2"], jnp.float32)      # (32, 64, 3)
    b2 = jnp.asarray(params["b2"], jnp.float32)      # (32,)
    wf = jnp.asarray(params["wf"], jnp.float32)      # (1, 32)
    bf = jnp.asarray(params["bf"], jnp.float32)      # (1,)

    # --- conv1 as (L*C_in, 4*64); output position order [0, 2, 1, 3] ---
    perm = (0, 2, 1, 3)
    col_blocks = []
    for p_out in perm:
        blk = jnp.zeros((L, C_in, 64), jnp.float32)
        for t in range(3):
            p_in = p_out + t - 1
            if 0 <= p_in < L:                        # "same" padding => drop OOB taps
                blk = blk.at[p_in].set(w1[:, :, t].T)
        col_blocks.append(blk.reshape(L * C_in, 64))
    W1 = jnp.concatenate(col_blocks, axis=1)         # (L*C_in, 256)

    # --- conv2 on pooled length-2 sequence [q0, q1] as (128, 256) ---
    # r0 = relu(b2 + w2[:,:,1]·q0 + w2[:,:,2]·q1)  -> lanes   0..31
    # r1 = relu(b2 + w2[:,:,0]·q0 + w2[:,:,1]·q1)  -> lanes 128..159
    W2 = jnp.zeros((2, 64, 256), jnp.float32)
    W2 = W2.at[0, :, 0:32].set(w2[:, :, 1].T)
    W2 = W2.at[1, :, 0:32].set(w2[:, :, 2].T)
    W2 = W2.at[0, :, 128:160].set(w2[:, :, 0].T)
    W2 = W2.at[1, :, 128:160].set(w2[:, :, 1].T)
    W2 = W2.reshape(128, 256)

    # --- fc; pooled features live in lanes 0..31, zero out the rest ---
    Wf = jnp.zeros((128, 1), jnp.float32).at[0:32, :].set(wf.T)

    # --- biases packed into one (3, 256) slab ---
    bias = jnp.zeros((3, 256), jnp.float32)
    bias = bias.at[0, :].set(jnp.tile(b1, 4))
    bias = bias.at[1, 0:32].set(b2)
    bias = bias.at[1, 128:160].set(b2)
    bias = bias.at[2, 0].set(bf[0])
    return W1, W2, Wf, bias


def cnn_forward(x_ncl, params, block_b=512):
    """x_ncl: (N, C_in, L) float32, PyTorch Conv1d layout. Returns (N, 1)."""
    N, C_in, L = x_ncl.shape
    assert L == 4, "fc = Linear(32, 1) after flatten requires final pooled length 1 => L == 4"

    W1, W2, Wf, bias = _build_dense_weights(params, C_in, L)

    # channels-last, then flatten each sample to L*C_in lane features (position-major)
    x_rows = jnp.transpose(x_ncl, (0, 2, 1)).reshape(N, L * C_in).astype(jnp.float32)

    # batch of B samples per grid step; B a multiple of 8 (sublane tiling)
    B = int(min(block_b, _round_up(N, 8)))
    B = max(8, _round_up(B, 8))
    N_pad = _round_up(N, B)
    if N_pad != N:
        x_rows = jnp.pad(x_rows, ((0, N_pad - N), (0, 0)))

    out = pl.pallas_call(
        _cnn_kernel,
        out_shape=jax.ShapeDtypeStruct((N_pad, 1), jnp.float32),
        grid_spec=pltpu.PrefetchScalarGridSpec(
            num_scalar_prefetch=0,
            grid=(N_pad // B,),
            in_specs=[
                pl.BlockSpec((B, L * C_in), lambda n: (n, 0)),   # B samples / step
                pl.BlockSpec((L * C_in, 256), lambda n: (0, 0)),  # weights resident
                pl.BlockSpec((128, 256), lambda n: (0, 0)),
                pl.BlockSpec((128, 1), lambda n: (0, 0)),
                pl.BlockSpec((3, 256), lambda n: (0, 0)),         # packed biases
            ],
            out_specs=pl.BlockSpec((B, 1), lambda n: (n, 0)),     # per-block output
        ),
        compiler_params=pltpu.CompilerParams(
            dimension_semantics=("parallel",)),                   # megacore-safe
    )(x_rows, W1, W2, Wf, bias)
    return out[:N]


def cnn_forward_ref(x_ncl, params):
    """Pure-JAX reference with the exact PyTorch semantics (NCL layout)."""
    def conv1d(x, w, b):
        y = jax.lax.conv_general_dilated(
            x, w, window_strides=(1,), padding=((1, 1),),
            dimension_numbers=("NCH", "OIH", "NCH"))
        return y + b[None, :, None]

    h = jax.nn.relu(conv1d(x_ncl, params["w1"], params["b1"]))
    h = jnp.max(h.reshape(h.shape[0], h.shape[1], h.shape[2] // 2, 2), axis=-1)
    h = jax.nn.relu(conv1d(h, params["w2"], params["b2"]))
    h = jnp.max(h.reshape(h.shape[0], h.shape[1], h.shape[2] // 2, 2), axis=-1)
    h = h.reshape(h.shape[0], -1)                    # (N, 32)
    return h @ params["wf"].T + params["bf"]


if __name__ == "__main__":
    N, C_in, L = 20, 8, 4
    key = jax.random.PRNGKey(0)
    ks = jax.random.split(key, 7)
    params = {
        "w1": jax.random.normal(ks[0], (64, C_in, 3), jnp.float32) * 0.1,
        "b1": jax.random.normal(ks[1], (64,), jnp.float32) * 0.1,
        "w2": jax.random.normal(ks[2], (32, 64, 3), jnp.float32) * 0.1,
        "b2": jax.random.normal(ks[3], (32,), jnp.float32) * 0.1,
        "wf": jax.random.normal(ks[4], (1, 32), jnp.float32) * 0.1,
        "bf": jax.random.normal(ks[5], (1,), jnp.float32) * 0.1,
    }
    x = jax.random.normal(ks[6], (N, C_in, L), jnp.float32)

    ref = jax.block_until_ready(cnn_forward_ref(x, params))

    # small block size to exercise multiple grid steps + tail padding
    out_small = jax.block_until_ready(cnn_forward(x, params, block_b=8))
    np.testing.assert_allclose(np.asarray(out_small), np.asarray(ref), rtol=1e-3, atol=1e-3)

    # default (production) block size: whole batch in one step here
    out = jax.block_until_ready(cnn_forward(x, params))
    np.testing.assert_allclose(np.asarray(out), np.asarray(ref), rtol=1e-3, atol=1e-3)

    assert out.shape == (N, 1)
    print("KERNEL_OK")
</pallas_src>

<mosaic_0001>
module attributes {stable_mosaic.version = 11 : i64} {
  func.func @_cnn_kernel(%arg0: i32, %arg1: memref<8x32xf32, #tpu.memory_space<vmem>>, %arg2: memref<32x256xf32, #tpu.memory_space<vmem>>, %arg3: memref<128x256xf32, #tpu.memory_space<vmem>>, %arg4: memref<128x1xf32, #tpu.memory_space<vmem>>, %arg5: memref<3x256xf32, #tpu.memory_space<vmem>>, %arg6: memref<8x1xf32, #tpu.memory_space<vmem>>) attributes {dimension_semantics = [#tpu.dimension_semantics<parallel>], iteration_bounds = array<i64: 3>, scalar_prefetch = 0 : i64, scratch_operands = 0 : i64, tpu.core_type = #tpu.core_type<tc>, window_params = [{transform_indices = @transform_0, window_bounds = array<i64: 8, 32>}, {pipeline_mode = #tpu.pipeline_mode<synchronous>, transform_indices = @transform_1, window_bounds = array<i64: 32, 256>}, {pipeline_mode = #tpu.pipeline_mode<synchronous>, transform_indices = @transform_2, window_bounds = array<i64: 128, 256>}, {pipeline_mode = #tpu.pipeline_mode<synchronous>, transform_indices = @transform_3, window_bounds = array<i64: 128, 1>}, {pipeline_mode = #tpu.pipeline_mode<synchronous>, transform_indices = @transform_4, window_bounds = array<i64: 3, 256>}, {transform_indices = @transform_5, window_bounds = array<i64: 8, 1>}]} {
    %c0 = arith.constant 0 : index
    %c0_0 = arith.constant 0 : index
    %0 = vector.load %arg1[%c0, %c0_0] : memref<8x32xf32, #tpu.memory_space<vmem>>, vector<8x32xf32>
    %c0_1 = arith.constant 0 : index
    %c0_2 = arith.constant 0 : index
    %1 = vector.load %arg5[%c0_1, %c0_2] : memref<3x256xf32, #tpu.memory_space<vmem>>, vector<1x256xf32>
    %c1 = arith.constant 1 : index
    %c0_3 = arith.constant 0 : index
    %2 = vector.load %arg5[%c1, %c0_3] : memref<3x256xf32, #tpu.memory_space<vmem>>, vector<1x256xf32>
    %c2 = arith.constant 2 : index
    %c0_4 = arith.constant 0 : index
    %3 = vector.load %arg5[%c2, %c0_4] : memref<3x256xf32, #tpu.memory_space<vmem>>, vector<1x1xf32>
    %c0_5 = arith.constant 0 : index
    %c0_6 = arith.constant 0 : index
    %4 = vector.load %arg2[%c0_5, %c0_6] : memref<32x256xf32, #tpu.memory_space<vmem>>, vector<32x256xf32>
    %cst = arith.constant dense<0.000000e+00> : vector<8x256xf32>
    %5 = tpu.matmul %0, %4, %cst {dimension_numbers = #tpu.dot_dimension_numbers<[1], [0], [0], [1], [0, 0, 1, 1], [], []>} : vector<8x32xf32>, vector<32x256xf32>, vector<8x256xf32> -> vector<8x256xf32>
    %6 = vector.broadcast %1 : vector<1x256xf32> to vector<8x256xf32>
    %7 = arith.addf %5, %6 : vector<8x256xf32>
    %cst_7 = arith.constant 0.000000e+00 : f32
    %8 = vector.broadcast %cst_7 : f32 to vector<8x256xf32>
    %9 = arith.maximumf %7, %8 : vector<8x256xf32>
    %10 = vector.extract_strided_slice %9 {offsets = [0, 0], sizes = [8, 128], strides = [1, 1]} : vector<8x256xf32> to vector<8x128xf32>
    %11 = vector.extract_strided_slice %9 {offsets = [0, 128], sizes = [8, 128], strides = [1, 1]} : vector<8x256xf32> to vector<8x128xf32>
    %12 = arith.maximumf %10, %11 : vector<8x128xf32>
    %c0_8 = arith.constant 0 : index
    %c0_9 = arith.constant 0 : index
    %13 = vector.load %arg3[%c0_8, %c0_9] : memref<128x256xf32, #tpu.memory_space<vmem>>, vector<128x256xf32>
    %cst_10 = arith.constant dense<0.000000e+00> : vector<8x256xf32>
    %14 = tpu.matmul %12, %13, %cst_10 {dimension_numbers = #tpu.dot_dimension_numbers<[1], [0], [0], [1], [0, 0, 1, 1], [], []>} : vector<8x128xf32>, vector<128x256xf32>, vector<8x256xf32> -> vector<8x256xf32>
    %15 = vector.broadcast %2 : vector<1x256xf32> to vector<8x256xf32>
    %16 = arith.addf %14, %15 : vector<8x256xf32>
    %cst_11 = arith.constant 0.000000e+00 : f32
    %17 = vector.broadcast %cst_11 : f32 to vector<8x256xf32>
    %18 = arith.maximumf %16, %17 : vector<8x256xf32>
    %19 = vector.extract_strided_slice %18 {offsets = [0, 0], sizes = [8, 128], strides = [1, 1]} : vector<8x256xf32> to vector<8x128xf32>
    %20 = vector.extract_strided_slice %18 {offsets = [0, 128], sizes = [8, 128], strides = [1, 1]} : vector<8x256xf32> to vector<8x128xf32>
    %21 = arith.maximumf %19, %20 : vector<8x128xf32>
    %c0_12 = arith.constant 0 : index
    %c0_13 = arith.constant 0 : index
    %22 = vector.load %arg4[%c0_12, %c0_13] : memref<128x1xf32, #tpu.memory_space<vmem>>, vector<128x1xf32>
    %cst_14 = arith.constant dense<0.000000e+00> : vector<8x1xf32>
    %23 = tpu.matmul %21, %22, %cst_14 {dimension_numbers = #tpu.dot_dimension_numbers<[1], [0], [0], [1], [0, 0, 1, 1], [], []>} : vector<8x128xf32>, vector<128x1xf32>, vector<8x1xf32> -> vector<8x1xf32>
    %24 = vector.broadcast %3 : vector<1x1xf32> to vector<8x1xf32>
    %25 = arith.addf %23, %24 : vector<8x1xf32>
    %c0_15 = arith.constant 0 : index
    %c0_16 = arith.constant 0 : index
    %26 = vector.load %arg6[%c0_15, %c0_16] : memref<8x1xf32, #tpu.memory_space<vmem>>, vector<8x1xf32>
    tpu.vector_store %arg6[%c0_15, %c0_16], %25 {strides = array<i32>} : memref<8x1xf32, #tpu.memory_space<vmem>>, vector<8x1xf32>,
    return
  }
  func.func @transform_0(%arg0: i32) -> (i32, i32) {
    %c0_i32 = arith.constant 0 : i32
    %c0_i32_0 = arith.constant 0 : i32
    return %arg0, %c0_i32 : i32, i32
  }
  func.func @transform_1(%arg0: i32) -> (i32, i32) {
    %c0_i32 = arith.constant 0 : i32
    %c0_i32_0 = arith.constant 0 : i32
    %c0_i32_1 = arith.constant 0 : i32
    return %c0_i32, %c0_i32_0 : i32, i32
  }
  func.func @transform_2(%arg0: i32) -> (i32, i32) {
    %c0_i32 = arith.constant 0 : i32
    %c0_i32_0 = arith.constant 0 : i32
    %c0_i32_1 = arith.constant 0 : i32
    return %c0_i32, %c0_i32_0 : i32, i32
  }
  func.func @transform_3(%arg0: i32) -> (i32, i32) {
    %c0_i32 = arith.constant 0 : i32
    %c0_i32_0 = arith.constant 0 : i32
    %c0_i32_1 = arith.constant 0 : i32
    return %c0_i32, %c0_i32_0 : i32, i32
  }
  func.func @transform_4(%arg0: i32) -> (i32, i32) {
    %c0_i32 = arith.constant 0 : i32
    %c0_i32_0 = arith.constant 0 : i32
    %c0_i32_1 = arith.constant 0 : i32
    return %c0_i32, %c0_i32_0 : i32, i32
  }
  func.func @transform_5(%arg0: i32) -> (i32, i32) {
    %c0_i32 = arith.constant 0 : i32
    %c0_i32_0 = arith.constant 0 : i32
    return %arg0, %c0_i32 : i32, i32
  }
}

</mosaic_0001>

<bundles_post_ra>
// kernel: tpu_custom_call.1
= control target key start
LH: loop header
LB: loop body
LE: loop exit
PB: predicated region body
PF: predicated region fallthrough
CT: control target
= control target key end

     0   :  { %10 = vsyncpa [#allocation3], 0  ;;  %s773_s18 = smov 0   ;;  %s919_s0 = inlined_call_operand.vmem [shape: f32[24,32], index: 0, kind: input, shape index: {}]   ;;  %s920_s1 = inlined_call_operand.vmem [shape: f32[32,256], index: 1, kind: input, shape index: {}]   ;;  %s921_s2 = inlined_call_operand.hbm [shape: f32[128,256], index: 2, kind: input, shape index: {}]   ;;  %s922_s3 = inlined_call_operand.vmem [shape: f32[128,1], index: 3, kind: input, shape index: {}]   ;;  %s923_s4 = inlined_call_operand.vmem [shape: f32[3,256], index: 4, kind: input, shape index: {}]   ;;  %s924_s5 = inlined_call_operand.vmem [shape: f32[24,1], index: 5, kind: output, shape index: {}]  }
   0x1 LB: > { %s779_s19 = sadd.s32 4294967295, %s736_s18   ;;  %p613_p0 = scmp.ge.s32.totalorder %s736_s18, 1  ;;  %s736_s18 = sphi %s773_s18, %s16_s18  }
   0x2   : > { %p157_p1 = scmp.lt.s32.totalorder %s736_s18, 4  ;;  %s738_s20 = smov [#allocation2]  }
   0x3   : > { %s172_s21 = sshll.u32 %s738_s20, 4  ;;  %p685_p3 = scmp.eq.s32.totalorder %s779_s19, 0  ;;  %s173_s21 = int_to_ptr.vmem [resolvable:$true] %s172_s21 }
   0x4   : > { %p783_p2 = pnand %p613_p0, %p157_p1  ;;  %s711_s23 = scalar_lea.vmem %s173_s21, 4096 }
   0x5   : > { %p712_p7 = scmp.ne.s32.totalorder %s173_s21, %s711_s23  ;;  %p719_p10 = scmp.lt.s32.totalorder %s173_s21, %s173_s21 }
   0x6   : > { %p681_p4 = pneg %p783_p2  ;;  %p720_p11 = scmp.lt.s32.totalorder %s711_s23, %s711_s23 }
   0x8   : > { %p682_p5 = pnand %p685_p3, %p681_p4  ;;  %p721_p12 = por %p720_p11, %p719_p10 }
   0xa   : > { %p702_p6 = pneg %p682_p5 }
   0xc   : > { %p714_p8 = pnand %p712_p7, %p702_p6 }
   0xe   : > { %p715_p9 = pneg %p714_p8 }
  0x10   : > { %p722_p13 = pnand %p721_p12, %p715_p9 }
  0x12   : > { %725 = shalt.err (!%p722_p13)
}
  0x13   : > { %s739_s24 = smov 256   ;;  %s740_s25 = smov 16  }
  0x14   : > { %684 = dma.hbm_to_vmem [thread:$0]  (!%p682_p5), %s921_s2, 4096, %s173_s21, [#allocation3], %s739_s24, %s739_s24, %s740_s25  }
  0x15   : > { %201 = sbr.rel (%p783_p2) target bundleno = 635 (0x27b), region = 40 }
  0x1a   : > { %731 = dma.done.wait (%p685_p3), [#allocation3], 4096  }
  0x1b   : > { %733 = vsyncadd (%p685_p3), [#allocation3], 4294963200  ;;  %p227_p0 = scmp.lt.s32.totalorder %s779_s19, 2  ;;  %v741_v0 = vmov 0.0   ;;  %v247_v1 = vld [vmem:[%s920_s1 + $0x38] sm:$0xff]  ;;  %v246_v2 = vld [vmem:[%s920_s1 + $0x30] sm:$0xff]  ;;  %v249_v53 = vlaneseq }
  0x1c   : > { %327 = vmatprep.mubr.f32.mxu0 %v741_v0  ;;  %444 = vmatprep.mubr.f32.mxu1 %v741_v0  ;;  %v245_v3 = vld [vmem:[%s920_s1 + $0x28] sm:$0xff]  ;;  %v244_v4 = vld [vmem:[%s920_s1 + $0x20] sm:$0xff]  ;;  %v243_v5 = vld [vmem:[%s920_s1 + $0x18] sm:$0xff]  ;;  %vm259_vm0 = vcmask 261120   ;;  %vm742_vm1 = vmmov 0   ;;  %vm544_vm2 = vcmask 7168  }
  0x1d   : > { %s927_s19 = smov (!%p227_p0, %s779_s19), 2  ;;  %287 = vmatprep.subr.mxu0 %v247_v1  ;;  %v242_v6 = vld [vmem:[%s920_s1 + $0x10] sm:$0xff]  ;;  %v368_v7 = vld [vmem:[#allocation2 + $0xf8] sm:$0xff]  ;;  %v366_v9 = vld [vmem:[#allocation2 + $0xe8] sm:$0xff]  ;;  %v250_v54 = vshrl.u32 %v249_v53, 7 }
  0x1e   : > { %s618_s9 = sshll.u32 %s927_s19, 3  ;;  %288 = vmatpush1.msra.mxu0 %v246_v2  ;;  %v367_v8 = vld [vmem:[#allocation2 + $0xf0] sm:$0xff]  ;;  %v241_v10 = vld [vmem:[%s920_s1 + $0x8] sm:$0xff]  ;;  %380 = vmatprep.subr.mxu1 %v368_v7  ;;  %v365_v11 = vld [vmem:[#allocation2 + $0xe0] sm:$0xff] }
  0x1f   : > { %289 = vmatprep.subr.mxu0 %v245_v3  ;;  %s230_s20 = scalar_lea.vmem %s919_s0, %s618_s9  ;;  %v240_v12 = vld [vmem:[%s920_s1] sm:$0xff]  ;;  %381 = vmatpush1.msra.mxu1 %v367_v8  ;;  %v364_v13 = vld [vmem:[#allocation2 + $0xd8] sm:$0xff]  ;;  %v363_v15 = vld [vmem:[#allocation2 + $0xd0] sm:$0xff]  ;;  %v251_v55 = vsub.s32 0, %v250_v54  ;;  %v255_v57 = vsub.s32 1, %v250_v54  ;;  %s234_s21 = scalar_lea.vmem %s924_s5, %s618_s9 }
  0x20   : > { %290 = vmatpush1.msra.mxu0 %v244_v4  ;;  %v235_v14 = vld [vmem:[%s230_s20] sm:$0xff]  ;;  %382 = vmatprep.subr.mxu1 %v366_v9  ;;  %v362_v16 = vld [vmem:[#allocation2 + $0xc8] sm:$0xff]  ;;  %v360_v18 = vld [vmem:[#allocation2 + $0xb8] sm:$0xff] }
  0x21   : > { %291 = vmatprep.subr.mxu0 %v243_v5  ;;  %383 = vmatpush1.msra.mxu1 %v365_v11  ;;  %v361_v17 = vld [vmem:[#allocation2 + $0xc0] sm:$0xff]  ;;  %v359_v19 = vld [vmem:[#allocation2 + $0xb0] sm:$0xff]  ;;  %v358_v20 = vld [vmem:[#allocation2 + $0xa8] sm:$0xff] }
  0x22   : > { %292 = vmatpush1.msra.mxu0 %v242_v6  ;;  %384 = vmatprep.subr.mxu1 %v364_v13  ;;  %v357_v21 = vld [vmem:[#allocation2 + $0xa0] sm:$0xff]  ;;  %v356_v22 = vld [vmem:[#allocation2 + $0x98] sm:$0xff]  ;;  %v355_v23 = vld [vmem:[#allocation2 + $0x90] sm:$0xff] }
  0x23   : > { %293 = vmatprep.subr.mxu0 %v241_v10  ;;  %385 = vmatpush1.msra.mxu1 %v363_v15  ;;  %v354_v24 = vld [vmem:[#allocation2 + $0x88] sm:$0xff]  ;;  %v353_v25 = vld [vmem:[#allocation2 + $0x80] sm:$0xff]  ;;  %v352_v26 = vld [vmem:[#allocation2 + $0x78] sm:$0xff] }
  0x24   : > { %294 = vmatpush1.msra.mxu0 %v240_v12  ;;  %386 = vmatprep.subr.mxu1 %v362_v16  ;;  %v351_v27 = vld [vmem:[#allocation2 + $0x70] sm:$0xff]  ;;  %v350_v28 = vld [vmem:[#allocation2 + $0x68] sm:$0xff]  ;;  %v349_v29 = vld [vmem:[#allocation2 + $0x60] sm:$0xff] }
  0x25   : > { %621 = vmatmul.mubr.msk.f32.vlgmr.msra.gmra.mxu0 %vm259_vm0, %v235_v14  ;;  %642 = vmatprep.subr.mxu0 %v741_v0  ;;  %v348_v30 = vld [vmem:[#allocation2 + $0x58] sm:$0xff]  ;;  %v347_v31 = vld [vmem:[#allocation2 + $0x50] sm:$0xff]  ;;  %v346_v32 = vld [vmem:[#allocation2 + $0x48] sm:$0xff] }
  0x26   : > { %387 = vmatpush1.msra.mxu1 %v361_v17  ;;  %v345_v33 = vld [vmem:[#allocation2 + $0x40] sm:$0xff]  ;;  %v344_v34 = vld [vmem:[#allocation2 + $0x38] sm:$0xff]  ;;  %v343_v35 = vld [vmem:[#allocation2 + $0x30] sm:$0xff]  ;;  %674 = vmatprep.mubr.msk.f32.mxu0 %vm742_vm1, %v741_v0 }
  0x27   : > { %388 = vmatprep.subr.mxu1 %v360_v18  ;;  %v342_v36 = vld [vmem:[#allocation2 + $0x28] sm:$0xff]  ;;  %v341_v37 = vld [vmem:[#allocation2 + $0x20] sm:$0xff]  ;;  %v340_v38 = vld [vmem:[#allocation2 + $0x18] sm:$0xff] }
  0x28   : > { %389 = vmatpush1.msra.mxu1 %v359_v19  ;;  %v339_v39 = vld [vmem:[#allocation2 + $0x10] sm:$0xff]  ;;  %v338_v40 = vld [vmem:[#allocation2 + $0x8] sm:$0xff]  ;;  %v337_v41 = vld [vmem:[#allocation2] sm:$0xff] }
  0x29   : > { %390 = vmatprep.subr.mxu1 %v358_v20  ;;  %v469_v42 = vld [vmem:[%s922_s3 + $0x78] sm:$0xff]  ;;  %v468_v43 = vld [vmem:[%s922_s3 + $0x70] sm:$0xff]  ;;  %v467_v44 = vld [vmem:[%s922_s3 + $0x68] sm:$0xff] }
  0x2a   : > { %391 = vmatpush1.msra.mxu1 %v357_v21  ;;  %643 = vmatpush3.msra.mxu0 %v469_v42  ;;  %v466_v45 = vld [vmem:[%s922_s3 + $0x60] sm:$0xff]  ;;  %v465_v46 = vld [vmem:[%s922_s3 + $0x58] sm:$0xff]  ;;  %v464_v47 = vld [vmem:[%s922_s3 + $0x50] sm:$0xff] }
  0x2b   : > { %392 = vmatprep.subr.mxu1 %v356_v22  ;;  %644 = vmatprep.subr.mxu0 %v741_v0  ;;  %v463_v48 = vld [vmem:[%s922_s3 + $0x48] sm:$0xff]  ;;  %v462_v49 = vld [vmem:[%s922_s3 + $0x40] sm:$0xff]  ;;  %v461_v50 = vld [vmem:[%s922_s3 + $0x38] sm:$0xff] }
  0x2c   : > { %393 = vmatpush1.msra.mxu1 %v355_v23  ;;  %645 = vmatpush3.msra.mxu0 %v468_v43  ;;  %v460_v51 = vld [vmem:[%s922_s3 + $0x30] sm:$0xff]  ;;  %v459_v52 = vld [vmem:[%s922_s3 + $0x28] sm:$0xff]  ;;  %v236_v56 = vld [vmem:[%s923_s4] ss:$4 sm:$0x3] }
  0x2d   : > { %394 = vmatprep.subr.mxu1 %v354_v24  ;;  %646 = vmatprep.subr.mxu0 %v741_v0  ;;  %v252_v58 = vrot.slane %v236_v56, %v251_v55  ;;  %v256_v59 = vrot.slane %v236_v56, %v255_v57  ;;  %v458_v4 = vld [vmem:[%s922_s3 + $0x20] sm:$0xff]  ;;  %v457_v5 = vld [vmem:[%s922_s3 + $0x18] sm:$0xff]  ;;  %v456_v6 = vld [vmem:[%s922_s3 + $0x10] sm:$0xff] }
  0x2e   : > { %395 = vmatpush1.msra.mxu1 %v353_v25  ;;  %647 = vmatpush3.msra.mxu0 %v467_v44  ;;  %v455_v7 = vld [vmem:[%s922_s3 + $0x8] sm:$0xff]  ;;  %v454_v8 = vld [vmem:[%s922_s3] sm:$0xff] }
  0x2f   : > { %396 = vmatprep.subr.mxu1 %v352_v26  ;;  %648 = vmatprep.subr.mxu0 %v741_v0  ;;  %v620_v9 = vld [vmem:[%s923_s4 + $0x1] ss:$4 sm:$0x3]  ;;  %v622_v19 = vld [vmem:[%s923_s4 + $0x2] ss:$0 sm:$0xff] }
  0x30   : > { %397 = vmatpush1.msra.mxu1 %v351_v27  ;;  %649 = vmatpush3.msra.mxu0 %v466_v45  ;;  %v373_v10 = vrot.slane %v620_v9, %v251_v55  ;;  %v377_v11 = vrot.slane %v620_v9, %v255_v57 }
  0x31   : > { %398 = vmatprep.subr.mxu1 %v350_v28  ;;  %650 = vmatprep.subr.mxu0 %v741_v0 }
  0x32   : > { %399 = vmatpush1.msra.mxu1 %v349_v29  ;;  %651 = vmatpush3.msra.mxu0 %v465_v46 }
  0x33   : > { %400 = vmatprep.subr.mxu1 %v348_v30  ;;  %652 = vmatprep.subr.mxu0 %v741_v0 }
  0x34   : > { %401 = vmatpush1.msra.mxu1 %v347_v31  ;;  %653 = vmatpush3.msra.mxu0 %v464_v47 }
  0x35   : > { %402 = vmatprep.subr.mxu1 %v346_v32  ;;  %654 = vmatprep.subr.mxu0 %v741_v0 }
  0x36   : > { %403 = vmatpush1.msra.mxu1 %v345_v33  ;;  %655 = vmatpush3.msra.mxu0 %v463_v48 }
  0x37   : > { %404 = vmatprep.subr.mxu1 %v344_v34  ;;  %656 = vmatprep.subr.mxu0 %v741_v0 }
  0x38   : > { %405 = vmatpush1.msra.mxu1 %v343_v35  ;;  %657 = vmatpush3.msra.mxu0 %v462_v49 }
  0x39   : > { %406 = vmatprep.subr.mxu1 %v342_v36  ;;  %658 = vmatprep.subr.mxu0 %v741_v0 }
  0x3a   : > { %407 = vmatpush1.msra.mxu1 %v341_v37  ;;  %659 = vmatpush3.msra.mxu0 %v461_v50 }
  0x3b   : > { %408 = vmatprep.subr.mxu1 %v340_v38  ;;  %660 = vmatprep.subr.mxu0 %v741_v0 }
  0x3c   : > { %409 = vmatpush1.msra.mxu1 %v339_v39  ;;  %661 = vmatpush3.msra.mxu0 %v460_v51 }
  0x3d   : > { %410 = vmatprep.subr.mxu1 %v338_v40  ;;  %662 = vmatprep.subr.mxu0 %v741_v0 }
  0x3e   : > { %411 = vmatpush1.msra.mxu1 %v337_v41  ;;  %663 = vmatpush3.msra.mxu0 %v459_v52 }
  0x3f   : > { %664 = vmatprep.subr.mxu0 %v741_v0 }
  0x40   : > { %665 = vmatpush3.msra.mxu0 %v458_v4 }
  0x41   : > { %666 = vmatprep.subr.mxu0 %v741_v0 }
  0x42   : > { %667 = vmatpush3.msra.mxu0 %v457_v5 }
  0x43   : > { %668 = vmatprep.subr.mxu0 %v741_v0 }
  0x44   : > { %669 = vmatpush3.msra.mxu0 %v456_v6 }
  0x45   : > { %670 = vmatprep.subr.mxu0 %v741_v0 }
  0x46   : > { %671 = vmatpush3.msra.mxu0 %v455_v7 }
  0x47   : > { %672 = vmatprep.subr.mxu0 %v741_v0 }
  0x48   : > { %673 = vmatpush3.msra.mxu0 %v454_v8 }
  0xe5   : > { %v329_v60 = vpop.f32.mrf.mxu0 }
  0xe6   : > { %v330_v61 = vadd.f32 %v329_v60, %v252_v58 }
  0xe7   : > { %v331_v62 = vpop.f32.mrf.mxu0 }
  0xe8   : > { %v332_v63 = vadd.f32 %v331_v62, %v256_v59  ;;  %v334_v1 = vmax.f32 %v330_v61, 0.0 }
  0xea   : > { %v335_v2 = vmax.f32 %v332_v63, 0.0 }
  0xec   : > { %v336_v3 = vmax.f32 %v334_v1, %v335_v2 }
  0xee   : > { %445 = vmatmul.mubr.f32.vlgmr.msra.gmra.mxu1 %v336_v3 }
 0x1ae   : > { %v446_v12 = vpop.f32.mrf.mxu1 }
 0x1af   : > { %v447_v13 = vadd.f32 %v446_v12, %v373_v10 }
 0x1b0   : > { %v448_v14 = vpop.f32.mrf.mxu1 }
 0x1b1   : > { %v449_v15 = vadd.f32 %v448_v14, %v377_v11  ;;  %v451_v16 = vmax.f32 %v447_v13, 0.0 }
 0x1b3   : > { %v452_v17 = vmax.f32 %v449_v15, 0.0 }
 0x1b5   : > { %v453_v18 = vmax.f32 %v451_v16, %v452_v17 }
 0x1b7   : > { %675 = vmatmul.mubr.f32.vlgmr.msra.gmra.mxu0 %v453_v18 }
 0x277   : > { %v540_v0 = vpop.f32.mrf.mxu0 }
 0x278   : > { %v541_v20 = vadd.f32 %v622_v19, %v540_v0 }
 0x279   : > { %v676_v21 = vpop.f32.mrf.mxu0 }
 0x27a   : > { %545 = vst.msk [vmem:[%s234_s21] sm:$0xff] %vm544_vm2, %v541_v20 }
 0x27b PF: > { %s16_s18 = sadd.s32 1, %s736_s18  }
 0x27c   : > { %p13_p1 = scmp.ge.s32.totalorder %s16_s18, 5  }
 0x27e   :  { %15 = sbr.rel (!%p13_p1) target bundleno = 1 (0x1), region = 76 }
 0x283   :  { %565 = vsyncpa [#allocation3], 1 }
 0x284   :  { %567 = vsyncpa [#allocation3 + $0x1], 1 }

</bundles_post_ra>
